<compile_context>
chip_gen: v7x
topology: tpu7x:2x2x1
jax: 0.10.0
libtpu: 0.0.40
codegen_flags: <defaults>
</compile_context>

<pallas_src>
import functools
import numpy as np
import jax
import jax.numpy as jnp
from jax import lax
from jax.experimental import pallas as pl
from jax.experimental.pallas import tpu as pltpu


def _n2r_r2r_r2n_kernel(x_ref, q_ref, p_ref, pt_ref, wqk_ref, gw_ref, gb_ref,
                        bias_ref, r2n_ref, attn_ref, *, scale, k_order, dq):
    # ---- N2R: node filtering + region projection (block-diag over Bt batches)
    x_filt = jnp.maximum(q_ref[...] * x_ref[...], 0.0)                    # (Bt*N, D)
    x_reg = jnp.dot(p_ref[...], x_filt,
                    preferred_element_type=jnp.float32)                   # (Bt*R, D)

    # ---- AdjGenerator: fused q/k projection, last-dim-contracted dot,
    #      block-diagonal additive mask keeps the softmax strictly per-batch.
    qk = jnp.dot(x_reg, wqk_ref[...],
                 preferred_element_type=jnp.float32)                      # (Bt*R, 2*dq)
    q = qk[:, :dq]
    k = qk[:, dq:]
    dots = lax.dot_general(q, k, (((1,), (1,)), ((), ())),
                           preferred_element_type=jnp.float32)            # (Bt*R, Bt*R)
    if scale != 1.0:
        dots = dots * scale
    dots = dots + bias_ref[...]                                           # mask off-batch
    m = jnp.max(dots, axis=-1, keepdims=True)
    e = jnp.exp(dots - m)                                                 # off-block -> 0
    attn = e * pl.reciprocal(jnp.sum(e, axis=-1, keepdims=True), approx=True)
    attn_ref[0] = attn

    # ---- R2R: K-order GCN on regions (attn is block-diagonal -> per-batch prop)
    h = x_reg
    out = jnp.dot(h, gw_ref[0], preferred_element_type=jnp.float32)       # (Bt*R, reg_dim)
    for kk in range(1, k_order):
        h = jnp.dot(attn, h, preferred_element_type=jnp.float32)
        out = out + jnp.dot(h, gw_ref[kk], preferred_element_type=jnp.float32)
    out = jnp.maximum(out + gb_ref[...], 0.0)                             # (Bt*R, reg_dim)

    # ---- R2N: back-project with the pre-transposed block-diag P^T (no .T here)
    r2n_ref[...] = jnp.dot(pt_ref[...], out,
                           preferred_element_type=jnp.float32)            # (Bt*N, reg_dim)


def _pick_bt(B, N, max_bt=8):
    """Pick a per-step batch tile: keep >=2 grid steps (v7x dual TC) and keep the
    flattened row block (Bt*N) sublane-aligned (multiple of 8)."""
    limit = max(1, min(B // 2, max_bt))
    candidates = [bt for bt in range(1, limit + 1)
                  if B % bt == 0 and (bt * N) % 8 == 0]
    if candidates:
        return max(candidates)
    # Fall back to a single full-array step (block == array -> always layout-legal).
    return B


def n2r_r2r_r2n_forward(x, Q, P, WqT, WkT, Wgcn, bgcn, *, scale=1.0, max_bt=8):
    """x: (B, N, D); Q: (N, D); P: (R, N); WqT/WkT: (D, D//4);
    Wgcn: (K, D, reg_dim); bgcn: (1, reg_dim).  Returns (reg2node, A_reg)."""
    B, N, D = x.shape
    R = P.shape[0]
    K, _, reg_dim = Wgcn.shape
    Dq = WqT.shape[1]

    Bt = _pick_bt(B, N, max_bt)
    S = B // Bt                      # number of grid steps

    # ---- host-side (one-time, free) layout prep: no transposes inside the kernel
    x_flat = x.reshape(B * N, D)
    Q_tile = jnp.tile(Q, (Bt, 1))                                   # (Bt*N, D)
    eye_bt = jnp.eye(Bt, dtype=jnp.float32)
    P_blk = jnp.kron(eye_bt, P.astype(jnp.float32))                 # (Bt*R, Bt*N)
    PT_blk = P_blk.T                                                # (Bt*N, Bt*R)
    Wqk = jnp.concatenate([WqT, WkT], axis=1)                       # (D, 2*Dq) fused q|k
    blk_mask = jnp.kron(eye_bt, jnp.ones((R, R), jnp.float32))      # 1 on-batch blocks
    bias = jnp.where(blk_mask > 0.5, 0.0, -1e30).astype(jnp.float32)

    kernel = functools.partial(_n2r_r2r_r2n_kernel, scale=scale, k_order=K, dq=Dq)

    out_shapes = (
        jax.ShapeDtypeStruct((B * N, reg_dim), jnp.float32),        # reg2node (flat)
        jax.ShapeDtypeStruct((S, Bt * R, Bt * R), jnp.float32),     # block-diag attn
    )

    grid_spec = pltpu.PrefetchScalarGridSpec(
        num_scalar_prefetch=0,
        grid=(S,),
        in_specs=[
            pl.BlockSpec((Bt * N, D), lambda i: (i, 0)),            # x rows of this tile
            pl.BlockSpec((Bt * N, D), lambda i: (0, 0)),            # Q (tiled, resident)
            pl.BlockSpec((Bt * R, Bt * N), lambda i: (0, 0)),       # block-diag P
            pl.BlockSpec((Bt * N, Bt * R), lambda i: (0, 0)),       # block-diag P^T
            pl.BlockSpec((D, 2 * Dq), lambda i: (0, 0)),            # fused Wq|Wk
            pl.BlockSpec((K, D, reg_dim), lambda i: (0, 0, 0)),     # GCN weights
            pl.BlockSpec((1, reg_dim), lambda i: (0, 0)),           # GCN bias
            pl.BlockSpec((Bt * R, Bt * R), lambda i: (0, 0)),       # softmax block mask
        ],
        out_specs=[
            pl.BlockSpec((Bt * N, reg_dim), lambda i: (i, 0)),
            pl.BlockSpec((1, Bt * R, Bt * R), lambda i: (i, 0, 0)),
        ],
    )

    r2n_flat, attn_full = pl.pallas_call(
        kernel,
        grid_spec=grid_spec,
        out_shape=out_shapes,
        compiler_params=pltpu.CompilerParams(
            dimension_semantics=("parallel",)),
    )(x_flat, Q_tile, P_blk, PT_blk, Wqk, Wgcn, bgcn, bias)

    reg2node = r2n_flat.reshape(B, N, reg_dim)
    # Extract the per-batch (R, R) diagonal blocks of the block-diagonal attention.
    A = attn_full.reshape(S, Bt, R, Bt, R)
    A_reg = jnp.moveaxis(jnp.diagonal(A, axis1=1, axis2=3), -1, 1).reshape(B, R, R)
    return reg2node, A_reg


def _reference(x, Q, P, WqT, WkT, Wgcn, bgcn, scale):
    """Pure-JAX reference of the same forward (for correctness checking)."""
    xf = jnp.maximum(Q[None] * x, 0.0)
    x_reg = jnp.einsum('rn,bnd->brd', P, xf)
    q = x_reg @ WqT
    k = x_reg @ WkT
    dots = jnp.einsum('bid,bjd->bij', q, k) * scale
    attn = jax.nn.softmax(dots, axis=-1)
    h = x_reg
    out = jnp.einsum('brd,de->bre', h, Wgcn[0])
    for kk in range(1, Wgcn.shape[0]):
        h = jnp.einsum('bij,bjd->bid', attn, h)
        out = out + jnp.einsum('brd,de->bre', h, Wgcn[kk])
    out = jnp.maximum(out + bgcn[None], 0.0)
    reg2node = jnp.einsum('rn,bre->bne', P, out)
    return reg2node, attn


def build_P(dataset_name, opt_idx, twin, n_chan):
    """region_select() from the reference module."""
    assert dataset_name == "MODMA" and opt_idx == 1
    Reg2Chan = {'R1': [0, 1], 'R2': [3, 4, 2, 5, 6], 'R3': [8, 9],
                'R4': [12, 13, 14], 'R5': [16, 17, 18], 'R6': [7, 11],
                'R7': [10, 15]}
    P = np.zeros((7, 19), dtype=np.float32)
    for i, idxs in enumerate(Reg2Chan.values()):
        P[i, idxs] = 1.0
    P = P / P.sum(axis=1, keepdims=True)
    P_expand = np.zeros((7 * twin, n_chan * twin), dtype=np.float32)
    for i in range(twin):
        P_expand[i * 7:(i + 1) * 7, i * n_chan:(i + 1) * n_chan] = P
    return jnp.asarray(P_expand)


def xavier_uniform(key, shape):
    fan_out, fan_in = shape
    bound = float(np.sqrt(6.0 / (fan_in + fan_out)))
    return jax.random.uniform(key, shape, jnp.float32, -bound, bound)


if __name__ == "__main__":
    # Small, module-consistent shapes.
    n_chan = 19            # fixed by P (7 regions x 19 channels)
    win_size = 2           # t_win
    in_dim = 32            # divisible by 4 (to_q/to_k: dim -> dim//4)
    reg_dim = 16
    K_R_GCN = 2
    bs = 8                 # small, but allows Bt=4 batch tiles x 2 parallel grid steps
    N = n_chan * win_size  # 38 nodes
    R = 7 * win_size       # 14 regions

    key = jax.random.PRNGKey(0)
    k_x, k_Q, k_wq, k_wk, k_gw = jax.random.split(key, 5)

    # Deterministic parameter init (synthetic, no checkpoint).
    x = jax.random.normal(k_x, (bs, N, in_dim), jnp.float32)
    Q = jax.random.normal(k_Q, (N, in_dim), jnp.float32)              # nn.Parameter(randn)
    Wq = xavier_uniform(k_wq, (in_dim // 4, in_dim))                  # torch Linear weight (out, in)
    Wk = xavier_uniform(k_wk, (in_dim // 4, in_dim))
    WqT = Wq.T                                                        # kernel does x @ W^T
    WkT = Wk.T
    Wgcn = 0.1 * jax.random.normal(k_gw, (K_R_GCN, in_dim, reg_dim), jnp.float32)
    bgcn = jnp.zeros((1, reg_dim), jnp.float32)
    P = build_P("MODMA", 1, win_size, n_chan)

    reg2node, A_reg = n2r_r2r_r2n_forward(
        x, Q, P, WqT, WkT, Wgcn, bgcn, scale=1.0)   # Tem=1 -> scale = 1
    jax.block_until_ready((reg2node, A_reg))

    assert reg2node.shape == (bs, N, reg_dim)
    assert A_reg.shape == (bs, R, R)

    # Softmax rows sum to ~1 (approx reciprocal -> relaxed tolerance).
    assert np.allclose(np.asarray(A_reg).sum(-1), 1.0, atol=5e-3)

    # Compare against the pure-JAX reference (tolerances cover approx recip + MXU).
    ref_r2n, ref_attn = _reference(x, Q, P, WqT, WkT, Wgcn, bgcn, 1.0)
    assert np.allclose(np.asarray(A_reg), np.asarray(ref_attn), atol=2e-2, rtol=2e-2)
    assert np.allclose(np.asarray(reg2node), np.asarray(ref_r2n), atol=2e-2, rtol=2e-2)

    print("KERNEL_OK")
</pallas_src>

<mosaic_0001>
module attributes {stable_mosaic.version = 11 : i64} {
  func.func @_n2r_r2r_r2n_kernel(%arg0: i32, %arg1: memref<152x32xf32, #tpu.memory_space<vmem>>, %arg2: memref<152x32xf32, #tpu.memory_space<vmem>>, %arg3: memref<56x152xf32, #tpu.memory_space<vmem>>, %arg4: memref<152x56xf32, #tpu.memory_space<vmem>>, %arg5: memref<32x16xf32, #tpu.memory_space<vmem>>, %arg6: memref<2x32x16xf32, #tpu.memory_space<vmem>>, %arg7: memref<1x16xf32, #tpu.memory_space<vmem>>, %arg8: memref<56x56xf32, #tpu.memory_space<vmem>>, %arg9: memref<152x16xf32, #tpu.memory_space<vmem>>, %arg10: memref<1x56x56xf32, #tpu.memory_space<vmem>>) attributes {dimension_semantics = [#tpu.dimension_semantics<parallel>], iteration_bounds = array<i64: 2>, scalar_prefetch = 0 : i64, scratch_operands = 0 : i64, tpu.core_type = #tpu.core_type<tc>, window_params = [{transform_indices = @transform_0, window_bounds = array<i64: 152, 32>}, {pipeline_mode = #tpu.pipeline_mode<synchronous>, transform_indices = @transform_1, window_bounds = array<i64: 152, 32>}, {pipeline_mode = #tpu.pipeline_mode<synchronous>, transform_indices = @transform_2, window_bounds = array<i64: 56, 152>}, {pipeline_mode = #tpu.pipeline_mode<synchronous>, transform_indices = @transform_3, window_bounds = array<i64: 152, 56>}, {pipeline_mode = #tpu.pipeline_mode<synchronous>, transform_indices = @transform_4, window_bounds = array<i64: 32, 16>}, {pipeline_mode = #tpu.pipeline_mode<synchronous>, transform_indices = @transform_5, window_bounds = array<i64: 2, 32, 16>}, {pipeline_mode = #tpu.pipeline_mode<synchronous>, transform_indices = @transform_6, window_bounds = array<i64: 1, 16>}, {pipeline_mode = #tpu.pipeline_mode<synchronous>, transform_indices = @transform_7, window_bounds = array<i64: 56, 56>}, {transform_indices = @transform_8, window_bounds = array<i64: 152, 16>}, {transform_indices = @transform_9, window_bounds = array<i64: 1, 56, 56>}]} {
    %c0 = arith.constant 0 : index
    %c0_0 = arith.constant 0 : index
    %0 = vector.load %arg2[%c0, %c0_0] : memref<152x32xf32, #tpu.memory_space<vmem>>, vector<152x32xf32>
    %c0_1 = arith.constant 0 : index
    %c0_2 = arith.constant 0 : index
    %1 = vector.load %arg1[%c0_1, %c0_2] : memref<152x32xf32, #tpu.memory_space<vmem>>, vector<152x32xf32>
    %2 = arith.mulf %0, %1 : vector<152x32xf32>
    %cst = arith.constant 0.000000e+00 : f32
    %3 = vector.broadcast %cst : f32 to vector<152x32xf32>
    %4 = arith.maximumf %2, %3 : vector<152x32xf32>
    %c0_3 = arith.constant 0 : index
    %c0_4 = arith.constant 0 : index
    %5 = vector.load %arg3[%c0_3, %c0_4] : memref<56x152xf32, #tpu.memory_space<vmem>>, vector<56x152xf32>
    %cst_5 = arith.constant dense<0.000000e+00> : vector<56x32xf32>
    %6 = tpu.matmul %5, %4, %cst_5 {dimension_numbers = #tpu.dot_dimension_numbers<[1], [0], [0], [1], [0, 0, 1, 1], [], []>} : vector<56x152xf32>, vector<152x32xf32>, vector<56x32xf32> -> vector<56x32xf32>
    %c0_6 = arith.constant 0 : index
    %c0_7 = arith.constant 0 : index
    %7 = vector.load %arg5[%c0_6, %c0_7] : memref<32x16xf32, #tpu.memory_space<vmem>>, vector<32x16xf32>
    %cst_8 = arith.constant dense<0.000000e+00> : vector<56x16xf32>
    %8 = tpu.matmul %6, %7, %cst_8 {dimension_numbers = #tpu.dot_dimension_numbers<[1], [0], [0], [1], [0, 0, 1, 1], [], []>} : vector<56x32xf32>, vector<32x16xf32>, vector<56x16xf32> -> vector<56x16xf32>
    %9 = vector.extract_strided_slice %8 {offsets = [0, 0], sizes = [56, 8], strides = [1, 1]} : vector<56x16xf32> to vector<56x8xf32>
    %10 = vector.extract_strided_slice %8 {offsets = [0, 8], sizes = [56, 8], strides = [1, 1]} : vector<56x16xf32> to vector<56x8xf32>
    %cst_9 = arith.constant dense<0.000000e+00> : vector<56x56xf32>
    %11 = tpu.matmul %9, %10, %cst_9 {dimension_numbers = #tpu.dot_dimension_numbers<[1], [1], [0], [0], [0, 0, 1, 0], [], []>} : vector<56x8xf32>, vector<56x8xf32>, vector<56x56xf32> -> vector<56x56xf32>
    %c0_10 = arith.constant 0 : index
    %c0_11 = arith.constant 0 : index
    %12 = vector.load %arg8[%c0_10, %c0_11] : memref<56x56xf32, #tpu.memory_space<vmem>>, vector<56x56xf32>
    %13 = arith.addf %11, %12 : vector<56x56xf32>
    %cst_12 = arith.constant dense<0xFF800000> : vector<56xf32>
    %14 = vector.multi_reduction <maximumf>, %13, %cst_12 [1] : vector<56x56xf32> to vector<56xf32>
    %15 = vector.shape_cast %14 : vector<56xf32> to vector<56x1xf32>
    %16 = vector.broadcast %15 : vector<56x1xf32> to vector<56x56xf32>
    %17 = arith.subf %13, %16 : vector<56x56xf32>
    %18 = math.exp %17 : vector<56x56xf32>
    %cst_13 = arith.constant dense<0.000000e+00> : vector<56xf32>
    %19 = vector.multi_reduction <add>, %18, %cst_13 [1] : vector<56x56xf32> to vector<56xf32>
    %20 = vector.shape_cast %19 : vector<56xf32> to vector<56x1xf32>
    %21 = tpu.reciprocal %20 {approx = true} : vector<56x1xf32> -> vector<56x1xf32>
    %22 = vector.broadcast %21 : vector<56x1xf32> to vector<56x56xf32>
    %23 = arith.mulf %18, %22 : vector<56x56xf32>
    %c0_14 = arith.constant 0 : index
    %c0_15 = arith.constant 0 : index
    %c0_16 = arith.constant 0 : index
    %24 = vector.load %arg10[%c0_14, %c0_15, %c0_16] : memref<1x56x56xf32, #tpu.memory_space<vmem>>, vector<1x56x56xf32>
    %25 = vector.shape_cast %24 : vector<1x56x56xf32> to vector<56x56xf32>
    %26 = vector.shape_cast %23 : vector<56x56xf32> to vector<1x56x56xf32>
    tpu.vector_store %arg10[%c0_14, %c0_15, %c0_16], %26 {strides = array<i32>} : memref<1x56x56xf32, #tpu.memory_space<vmem>>, vector<1x56x56xf32>,
    %c0_17 = arith.constant 0 : index
    %c0_18 = arith.constant 0 : index
    %c0_19 = arith.constant 0 : index
    %27 = vector.load %arg6[%c0_17, %c0_18, %c0_19] : memref<2x32x16xf32, #tpu.memory_space<vmem>>, vector<1x32x16xf32>
    %28 = vector.shape_cast %27 : vector<1x32x16xf32> to vector<32x16xf32>
    %cst_20 = arith.constant dense<0.000000e+00> : vector<56x16xf32>
    %29 = tpu.matmul %6, %28, %cst_20 {dimension_numbers = #tpu.dot_dimension_numbers<[1], [0], [0], [1], [0, 0, 1, 1], [], []>} : vector<56x32xf32>, vector<32x16xf32>, vector<56x16xf32> -> vector<56x16xf32>
    %cst_21 = arith.constant dense<0.000000e+00> : vector<56x32xf32>
    %30 = tpu.matmul %23, %6, %cst_21 {dimension_numbers = #tpu.dot_dimension_numbers<[1], [0], [0], [1], [0, 0, 1, 1], [], []>} : vector<56x56xf32>, vector<56x32xf32>, vector<56x32xf32> -> vector<56x32xf32>
    %c1 = arith.constant 1 : index
    %c0_22 = arith.constant 0 : index
    %c0_23 = arith.constant 0 : index
    %31 = vector.load %arg6[%c1, %c0_22, %c0_23] : memref<2x32x16xf32, #tpu.memory_space<vmem>>, vector<1x32x16xf32>
    %32 = vector.shape_cast %31 : vector<1x32x16xf32> to vector<32x16xf32>
    %cst_24 = arith.constant dense<0.000000e+00> : vector<56x16xf32>
    %33 = tpu.matmul %30, %32, %cst_24 {dimension_numbers = #tpu.dot_dimension_numbers<[1], [0], [0], [1], [0, 0, 1, 1], [], []>} : vector<56x32xf32>, vector<32x16xf32>, vector<56x16xf32> -> vector<56x16xf32>
    %34 = arith.addf %29, %33 : vector<56x16xf32>
    %c0_25 = arith.constant 0 : index
    %c0_26 = arith.constant 0 : index
    %35 = vector.load %arg7[%c0_25, %c0_26] : memref<1x16xf32, #tpu.memory_space<vmem>>, vector<1x16xf32>
    %36 = vector.broadcast %35 : vector<1x16xf32> to vector<56x16xf32>
    %37 = arith.addf %34, %36 : vector<56x16xf32>
    %cst_27 = arith.constant 0.000000e+00 : f32
    %38 = vector.broadcast %cst_27 : f32 to vector<56x16xf32>
    %39 = arith.maximumf %37, %38 : vector<56x16xf32>
    %c0_28 = arith.constant 0 : index
    %c0_29 = arith.constant 0 : index
    %40 = vector.load %arg4[%c0_28, %c0_29] : memref<152x56xf32, #tpu.memory_space<vmem>>, vector<152x56xf32>
    %cst_30 = arith.constant dense<0.000000e+00> : vector<152x16xf32>
    %41 = tpu.matmul %40, %39, %cst_30 {dimension_numbers = #tpu.dot_dimension_numbers<[1], [0], [0], [1], [0, 0, 1, 1], [], []>} : vector<152x56xf32>, vector<56x16xf32>, vector<152x16xf32> -> vector<152x16xf32>
    %c0_31 = arith.constant 0 : index
    %c0_32 = arith.constant 0 : index
    %42 = vector.load %arg9[%c0_31, %c0_32] : memref<152x16xf32, #tpu.memory_space<vmem>>, vector<152x16xf32>
    tpu.vector_store %arg9[%c0_31, %c0_32], %41 {strides = array<i32>} : memref<152x16xf32, #tpu.memory_space<vmem>>, vector<152x16xf32>,
    return
  }
  func.func @transform_0(%arg0: i32) -> (i32, i32) {
    %c0_i32 = arith.constant 0 : i32
    %c0_i32_0 = arith.constant 0 : i32
    return %arg0, %c0_i32 : i32, i32
  }
  func.func @transform_1(%arg0: i32) -> (i32, i32) {
    %c0_i32 = arith.constant 0 : i32
    %c0_i32_0 = arith.constant 0 : i32
    %c0_i32_1 = arith.constant 0 : i32
    return %c0_i32, %c0_i32_0 : i32, i32
  }
  func.func @transform_2(%arg0: i32) -> (i32, i32) {
    %c0_i32 = arith.constant 0 : i32
    %c0_i32_0 = arith.constant 0 : i32
    %c0_i32_1 = arith.constant 0 : i32
    return %c0_i32, %c0_i32_0 : i32, i32
  }
  func.func @transform_3(%arg0: i32) -> (i32, i32) {
    %c0_i32 = arith.constant 0 : i32
    %c0_i32_0 = arith.constant 0 : i32
    %c0_i32_1 = arith.constant 0 : i32
    return %c0_i32, %c0_i32_0 : i32, i32
  }
  func.func @transform_4(%arg0: i32) -> (i32, i32) {
    %c0_i32 = arith.constant 0 : i32
    %c0_i32_0 = arith.constant 0 : i32
    %c0_i32_1 = arith.constant 0 : i32
    return %c0_i32, %c0_i32_0 : i32, i32
  }
  func.func @transform_5(%arg0: i32) -> (i32, i32, i32) {
    %c0_i32 = arith.constant 0 : i32
    %c0_i32_0 = arith.constant 0 : i32
    %c0_i32_1 = arith.constant 0 : i32
    %c0_i32_2 = arith.constant 0 : i32
    return %c0_i32, %c0_i32_0, %c0_i32_1 : i32, i32, i32
  }
  func.func @transform_6(%arg0: i32) -> (i32, i32) {
    %c0_i32 = arith.constant 0 : i32
    %c0_i32_0 = arith.constant 0 : i32
    %c0_i32_1 = arith.constant 0 : i32
    return %c0_i32, %c0_i32_0 : i32, i32
  }
  func.func @transform_7(%arg0: i32) -> (i32, i32) {
    %c0_i32 = arith.constant 0 : i32
    %c0_i32_0 = arith.constant 0 : i32
    %c0_i32_1 = arith.constant 0 : i32
    return %c0_i32, %c0_i32_0 : i32, i32
  }
  func.func @transform_8(%arg0: i32) -> (i32, i32) {
    %c0_i32 = arith.constant 0 : i32
    %c0_i32_0 = arith.constant 0 : i32
    return %arg0, %c0_i32 : i32, i32
  }
  func.func @transform_9(%arg0: i32) -> (i32, i32, i32) {
    %c0_i32 = arith.constant 0 : i32
    %c0_i32_0 = arith.constant 0 : i32
    %c0_i32_1 = arith.constant 0 : i32
    return %arg0, %c0_i32, %c0_i32_0 : i32, i32, i32
  }
}

</mosaic_0001>

<bundles_post_ra>
// kernel: tpu_custom_call.1
= control target key start
LH: loop header
LB: loop body
LE: loop exit
PB: predicated region body
PF: predicated region fallthrough
CT: control target
= control target key end

     0   :  { %15 = vsyncpa [#allocation3], 0  ;;  %s3049_s0 = inlined_call_operand.vmem [shape: f32[304,32], index: 0, kind: input, shape index: {}]   ;;  %s3050_s1 = inlined_call_operand.vmem [shape: f32[152,32], index: 1, kind: input, shape index: {}]   ;;  %s3051_s2 = inlined_call_operand.vmem [shape: f32[56,152], index: 2, kind: input, shape index: {}]   ;;  %s3052_s3 = inlined_call_operand.vmem [shape: f32[152,56], index: 3, kind: input, shape index: {}]   ;;  %s3053_s4 = inlined_call_operand.vmem [shape: f32[32,16], index: 4, kind: input, shape index: {}]   ;;  %s3054_s5 = inlined_call_operand.vmem [shape: f32[2,32,16], index: 5, kind: input, shape index: {}]   ;;  %s3055_s6 = inlined_call_operand.vmem [shape: f32[1,16], index: 6, kind: input, shape index: {}]   ;;  %s3056_s7 = inlined_call_operand.vmem [shape: f32[56,56], index: 7, kind: input, shape index: {}]   ;;  %s3057_s8 = inlined_call_operand.vmem [shape: f32[304,16], index: 8, kind: output, shape index: {0}]   ;;  %s3058_s9 = inlined_call_operand.hbm [shape: f32[2,56,56], index: 9, kind: output, shape index: {1}]  }
   0x1   :  { %17 = vsyncpa [#allocation3 + $0x1], 0  ;;  %s2356_s30 = smov 0   ;;  %s2358_s10 = smov 0  }
   0x2   :  { %s2360_s11 = smov 0   ;;  %s2362_s12 = smov 0  }
   0x3 LB: > { %s2377_s13 = sadd.s32 4294967295, %s2297_s12   ;;  %s1665_s14 = sadd.s32 4294967294, %s2297_s12   ;;  %s2297_s12 = sphi %s2362_s12, %s3066_s12   ;;  %s2293_s11 = sphi %s2360_s11, %s3065_s11   ;;  %s2289_s10 = sphi %s2358_s10, %s3064_s10   ;;  %s2285_s30 = sphi %s2356_s30, %s3063_s30  }
   0x4   : > { %s2381_s15 = sadd.s32 1, %s2297_s12   ;;  %s229_s16 = sadd.s32 1, %s2293_s11 }
   0x5   : > { %s226_s17 = ssub.s32 %s2297_s12, %s2381_s15  ;;  %p239_p0 = scmp.ne.s32.totalorder %s2293_s11, %s2289_s10 }
   0x6   : > { %p227_p1 = scmp.eq.s32.totalorder %s226_s17, 0  ;;  %p240_p2 = scmp.eq.s32.totalorder %s2377_s13, 1 }
   0x7   : > { %p245_p3 = scmp.ne.s32.totalorder %s2289_s10, %s2285_s30  ;;  %p246_p4 = scmp.eq.s32.totalorder %s1665_s14, 1 }
   0x8   : > { %s2392_s18 = scalar_select %p227_p1, %s2293_s11, %s229_s16  }
   0x9   : > { %p2394_p5 = por %p240_p2, %p239_p0  ;;  %p2398_p6 = por %p246_p4, %p245_p3 }
   0xa   : > { %3059 = sst [smem:[#allocation5_spill]] %s2392_s18  ;;  %p1668_p7 = scmp.ge.s32.totalorder %s2297_s12, 1 }
   0xb   : > { %p294_p8 = scmp.lt.s32.totalorder %s2297_s12, 3 }
   0xd   : > { %p295_p9 = pnand %p1668_p7, %p294_p8 }
   0xe   : > { %s335_s21 = smul.u32 (!%p295_p9), 19, %s2377_s13  ;;  %v2299_v0 = vmov (!%p295_p9), 0.0|0.0   ;;  %vm437_vm0 = vcmask (!%p295_p9), 195584   ;;  %v347_v1 = vld [vmem:[%s3050_s1] sm:$0xff] (!%p295_p9)  ;;  %v348_v2 = vld [vmem:[%s3050_s1 + $0x8] sm:$0xff] (!%p295_p9)  ;;  %v349_v3 = vld [vmem:[%s3050_s1 + $0x10] sm:$0xff] (!%p295_p9) }
   0xf   : > { %298 = sbr.rel (%p295_p9) target bundleno = 1891 (0x763), region = 52  ;;  %2062 = vmatprep.subr.bf16.mxu0 (!%p295_p9), %v2299_v0  ;;  %2089 = vmatprep.subr.bf16.mxu1 (!%p295_p9), %v2299_v0  ;;  %v424_v4 = vld [vmem:[%s3051_s2 + $0x8] sm:$0xff] (!%p295_p9)  ;;  %v350_v5 = vld [vmem:[%s3050_s1 + $0x18] sm:$0xff] (!%p295_p9)  ;;  %v351_v6 = vld [vmem:[%s3050_s1 + $0x20] sm:$0xff] (!%p295_p9)  ;;  %vm2301_vm1 = vmmov (!%p295_p9), 0   ;;  %vm563_vm2 = vcmask (!%p295_p9), 261120  }
  0x10   : > { %p336_p10 = scmp.lt.s32.totalorder (!%p295_p9), %s335_s21, 37  ;;  %v352_v7 = vld [vmem:[%s3050_s1 + $0x28] sm:$0xff] (!%p295_p9)  ;;  %1671 = vmatprep.mubr.msk.f32.mxu0 (!%p295_p9), %vm437_vm0, %v424_v4  ;;  %v353_v23 = vld [vmem:[%s3050_s1 + $0x30] sm:$0xff] (!%p295_p9)  ;;  %v354_v26 = vld [vmem:[%s3050_s1 + $0x38] sm:$0xff] (!%p295_p9)  ;;  %vm713_vm3 = vcmask (!%p295_p9), 64512   ;;  %vm842_vm5 = vcmask (!%p295_p9), 457728  }
  0x11   : > { %v355_v34 = vld [vmem:[%s3050_s1 + $0x40] sm:$0xff] (!%p295_p9)  ;;  %v356_v36 = vld [vmem:[%s3050_s1 + $0x48] sm:$0xff] (!%p295_p9)  ;;  %v561_v42 = vld [vmem:[%s3053_s4 + $0x10] sm:$0xff] (!%p295_p9)  ;;  %s332_s27 = sand.u32 (!%p295_p9), 1, %s2289_s10   ;;  %s2146_s17 = smul.u32 (!%p295_p9), 896, %s2377_s13 }
  0x12   : > { %v559_v38 = vld [vmem:[%s3053_s4] sm:$0xff] (!%p295_p9)  ;;  %v560_v39 = vld [vmem:[%s3053_s4 + $0x8] sm:$0xff] (!%p295_p9)  ;;  %v562_v43 = vld [vmem:[%s3053_s4 + $0x18] sm:$0xff] (!%p295_p9)  ;;  %s2145_s28 = smul.u32 (!%p295_p9), 56, %s332_s27  ;;  %s2303_s13 = smov (!%p295_p9), [#allocation2]  }
  0x13   : > { %v357_v47 = vld [vmem:[%s3050_s1 + $0x50] sm:$0xff] (!%p295_p9)  ;;  %v2090_v49 = vpack.c.bf16 (!%p295_p9), %v560_v39, %v559_v38  ;;  %v358_v50 = vld [vmem:[%s3050_s1 + $0x58] sm:$0xff] (!%p295_p9)  ;;  %v2093_v52 = vpack.c.bf16 (!%p295_p9), %v562_v43, %v561_v42  ;;  %v359_v58 = vld [vmem:[%s3050_s1 + $0x60] sm:$0xff] (!%p295_p9)  ;;  %s2957_s26 = scalar_lea.hbm (!%p295_p9), %s3058_s9, %s2146_s17 }
  0x14   : > { %v360_v60 = vld [vmem:[%s3050_s1 + $0x68] sm:$0xff] (!%p295_p9)  ;;  %v361_v4 = vld [vmem:[%s3050_s1 + $0x70] sm:$0xff] (!%p295_p9)  ;;  %v431_v39 = vld [vmem:[%s3051_s2 + $0x40] sm:$0xff] (!%p295_p9) }
  0x15   : > { %2091 = vmatpush3.bf16.msra.mxu1 (!%p295_p9), %v2090_v49  ;;  %v432_v38 = vld [vmem:[%s3051_s2 + $0x48] sm:$0xff] (!%p295_p9)  ;;  %v435_v43 = vld [vmem:[%s3051_s2 + $0x60] sm:$0xff] (!%p295_p9)  ;;  %vm2097_vm4 = vmpackc.low (!%p295_p9), %vm713_vm3, %vm713_vm3 }
  0x16   : > { %s3068_s21 = smov (!%p336_p10, %s335_s21), 37  ;;  %2092 = vmatprep.subr.bf16.mxu1 %v2299_v0  ;;  %v436_v42 = vld [vmem:[%s3051_s2 + $0x68] sm:$0xff] }
  0x17   : > { %s1669_s24 = sshll.u32 %s3068_s21, 3 }
  0x18   : > { %s2427_s18 = scalar_lea.vmem %s3049_s0, %s1669_s24 }
  0x19   : > { %v366_v8 = vld [vmem:[%s2427_s18] sm:$0xff]  ;;  %v367_v9 = vld [vmem:[%s2427_s18 + $0x8] sm:$0xff]  ;;  %v368_v10 = vld [vmem:[%s2427_s18 + $0x10] sm:$0xff]  ;;  %2094 = vmatpush3.bf16.msra.mxu1 %v2093_v52 }
  0x1a   : > { %v385_v11 = vmul.f32 %v366_v8, %v347_v1  ;;  %v386_v12 = vmul.f32 %v367_v9, %v348_v2  ;;  %v369_v13 = vld [vmem:[%s2427_s18 + $0x18] sm:$0xff]  ;;  %v387_v14 = vmul.f32 %v368_v10, %v349_v3  ;;  %v370_v15 = vld [vmem:[%s2427_s18 + $0x20] sm:$0xff]  ;;  %v371_v16 = vld [vmem:[%s2427_s18 + $0x28] sm:$0xff]  ;;  %2095 = vmatprep.subr.bf16.mxu1 %v2299_v0 }
  0x1b   : > { %v388_v17 = vmul.f32 %v369_v13, %v350_v5  ;;  %v389_v18 = vmul.f32 %v370_v15, %v351_v6  ;;  %v390_v22 = vmul.f32 %v371_v16, %v352_v7  ;;  %v372_v24 = vld [vmem:[%s2427_s18 + $0x30] sm:$0xff]  ;;  %v373_v27 = vld [vmem:[%s2427_s18 + $0x38] sm:$0xff]  ;;  %v374_v35 = vld [vmem:[%s2427_s18 + $0x40] sm:$0xff] }
  0x1c   : > { %v404_v19 = vmax.f32 %v385_v11, 0.0  ;;  %v405_v20 = vmax.f32 %v386_v12, 0.0  ;;  %v406_v21 = vmax.f32 %v387_v14, 0.0  ;;  %v391_v29 = vmul.f32 %v372_v24, %v353_v23  ;;  %v375_v37 = vld [vmem:[%s2427_s18 + $0x48] sm:$0xff]  ;;  %v376_v48 = vld [vmem:[%s2427_s18 + $0x50] sm:$0xff]  ;;  %v377_v51 = vld [vmem:[%s2427_s18 + $0x58] sm:$0xff] }
  0x1d   : > { %v407_v25 = vmax.f32 %v388_v17, 0.0  ;;  %v408_v31 = vmax.f32 %v389_v18, 0.0  ;;  %v409_v32 = vmax.f32 %v390_v22, 0.0  ;;  %v392_v33 = vmul.f32 %v373_v27, %v354_v26  ;;  %v378_v59 = vld [vmem:[%s2427_s18 + $0x60] sm:$0xff]  ;;  %v379_v61 = vld [vmem:[%s2427_s18 + $0x68] sm:$0xff]  ;;  %v380_v5 = vld [vmem:[%s2427_s18 + $0x70] sm:$0xff] }
  0x1e   : > { %v2063_v28 = vpack.c.bf16 %v405_v20, %v404_v19  ;;  %v410_v40 = vmax.f32 %v391_v29, 0.0  ;;  %v393_v41 = vmul.f32 %v374_v35, %v355_v34  ;;  %v394_v46 = vmul.f32 %v375_v37, %v356_v36  ;;  %v362_v6 = vld [vmem:[%s3050_s1 + $0x78] sm:$0xff]  ;;  %v363_v13 = vld [vmem:[%s3050_s1 + $0x80] sm:$0xff]  ;;  %v364_v14 = vld [vmem:[%s3050_s1 + $0x88] sm:$0xff] }
  0x1f   : > { %v2066_v30 = vpack.c.bf16 %v407_v25, %v406_v21  ;;  %v2069_v44 = vpack.c.bf16 %v409_v32, %v408_v31  ;;  %v411_v45 = vmax.f32 %v392_v33, 0.0  ;;  %v395_v53 = vmul.f32 %v376_v48, %v357_v47  ;;  %v381_v7 = vld [vmem:[%s2427_s18 + $0x78] sm:$0xff]  ;;  %v382_v15 = vld [vmem:[%s2427_s18 + $0x80] sm:$0xff]  ;;  %v383_v16 = vld [vmem:[%s2427_s18 + $0x88] sm:$0xff] }
  0x20   : > { %2064 = vmatpush1.bf16.msra.mxu0 %v2063_v28  ;;  %v412_v55 = vmax.f32 %v393_v41, 0.0  ;;  %v413_v56 = vmax.f32 %v394_v46, 0.0  ;;  %v396_v57 = vmul.f32 %v377_v51, %v358_v50  ;;  %v397_v62 = vmul.f32 %v378_v59, %v359_v58  ;;  %v365_v25 = vld [vmem:[%s3050_s1 + $0x90] sm:$0xff]  ;;  %v423_v31 = vld [vmem:[%s3051_s2] sm:$0xff]  ;;  %v426_v32 = vld [vmem:[%s3051_s2 + $0x18] sm:$0xff] }
  0x21   : > { %2065 = vmatprep.subr.bf16.mxu0 %v2299_v0  ;;  %v2072_v54 = vpack.c.bf16 %v411_v45, %v410_v40  ;;  %v414_v1 = vmax.f32 %v395_v53, 0.0  ;;  %v398_v3 = vmul.f32 %v379_v61, %v360_v60  ;;  %v399_v8 = vmul.f32 %v380_v5, %v361_v4  ;;  %v384_v26 = vld [vmem:[%s2427_s18 + $0x90] sm:$0xff]  ;;  %v428_v34 = vld [vmem:[%s3051_s2 + $0x28] sm:$0xff]  ;;  %v427_v35 = vld [vmem:[%s3051_s2 + $0x20] sm:$0xff]  ;;  %s2302_s18 = smov 120  }
  0x22   : > { %v2075_v63 = vpack.c.bf16 %v413_v56, %v412_v55  ;;  %v415_v2 = vmax.f32 %v396_v57, 0.0  ;;  %v416_v10 = vmax.f32 %v397_v62, 0.0  ;;  %v400_v12 = vmul.f32 %v381_v7, %v362_v6  ;;  %v425_v33 = vld [vmem:[%s3051_s2 + $0x10] sm:$0xff]  ;;  %v430_v36 = vld [vmem:[%s3051_s2 + $0x38] sm:$0xff] }
  0x23   : > { %v417_v11 = vmax.f32 %v398_v3, 0.0  ;;  %v418_v17 = vmax.f32 %v399_v8, 0.0  ;;  %v401_v20 = vmul.f32 %v382_v15, %v363_v13  ;;  %v402_v21 = vmul.f32 %v383_v16, %v364_v14  ;;  %v429_v37 = vld [vmem:[%s3051_s2 + $0x30] sm:$0xff]  ;;  %v434_v40 = vld [vmem:[%s3051_s2 + $0x58] sm:$0xff] }
  0x24   : > { %2067 = vmatpush1.bf16.msra.mxu0 %v2066_v30  ;;  %v2078_v9 = vpack.c.bf16 %v415_v2, %v414_v1  ;;  %v419_v19 = vmax.f32 %v400_v12, 0.0  ;;  %v403_v28 = vmul.f32 %v384_v26, %v365_v25  ;;  %v2300_v30 = vmov 0.0   ;;  %v433_v41 = vld [vmem:[%s3051_s2 + $0x50] sm:$0xff] }
  0x25   : > { %2068 = vmatprep.subr.bf16.mxu0 %v2299_v0  ;;  %v2081_v18 = vpack.c.bf16 %v417_v11, %v416_v10  ;;  %v420_v23 = vmax.f32 %v401_v20, 0.0  ;;  %v421_v24 = vmax.f32 %v402_v21, 0.0  ;;  %1842 = vmatprep.mubr.msk.f32.mxu1 %vm2301_vm1, %v2300_v30 }
  0x26   : > { %v2084_v22 = vpack.c.bf16 %v419_v19, %v418_v17  ;;  %v422_v29 = vmax.f32 %v403_v28, 0.0  ;;  %v685_v28 = vld [vmem:[%s3056_s7] sm:$0xff] }
  0x27   : > { %v2087_v27 = vpack.c.bf16 %v421_v24, %v420_v23 }
  0x28   : > { %2070 = vmatpush1.bf16.msra.mxu0 %v2069_v44 }
  0x29   : > { %2071 = vmatprep.subr.bf16.mxu0 %v2299_v0 }
  0x2c   : > { %2073 = vmatpush1.bf16.msra.mxu0 %v2072_v54 }
  0x2d   : > { %2074 = vmatprep.subr.bf16.mxu0 %v2299_v0 }
  0x30   : > { %2076 = vmatpush1.bf16.msra.mxu0 %v2075_v63 }
  0x31   : > { %2077 = vmatprep.subr.bf16.mxu0 %v2299_v0 }
  0x34   : > { %2079 = vmatpush1.bf16.msra.mxu0 %v2078_v9 }
  0x35   : > { %2080 = vmatprep.subr.bf16.mxu0 %v2299_v0 }
  0x38   : > { %2082 = vmatpush1.bf16.msra.mxu0 %v2081_v18 }
  0x39   : > { %2083 = vmatprep.subr.bf16.mxu0 %v2299_v0 }
  0x3c   : > { %2085 = vmatpush1.bf16.msra.mxu0 %v2084_v22 }
  0x3d   : > { %2086 = vmatprep.subr.bf16.mxu0 %v2299_v0 }
  0x40   : > { %2088 = vmatpush1.bf16.msra.mxu0 %v2087_v27 }
  0x41   : > { %495 = vmatprep.subr.mxu0 %v2300_v30 }
  0x44   : > { %496 = vmatpush1.msra.mxu0 %v422_v29 }
  0x45   : > { %524 = vmatmul.mubr.f32.vlgmr.msra.gmra.mrb[0].mxu0 %v423_v31  ;;  %2116 = vmatprep.subr.bf16.mxu0 %v2299_v0 }
  0x46   : > { %1672 = vmatprep.mubr.msk.f32.mxu0 %vm437_vm0, %v426_v32 }
  0x49   : > { %529 = vmatmul.mubr.f32.gmra.mrb[2].mxu0 %v425_v33  ;;  %v686_v33 = vld [vmem:[%s3056_s7 + $0x8] sm:$0xff] }
  0x4a   : > { %1673 = vmatprep.mubr.msk.f32.mxu0 %vm437_vm0, %v428_v34 }
  0x4d   : > { %534 = vmatmul.mubr.f32.gmra.mrb[4].mxu0 %v427_v35 }
  0x4e   : > { %1674 = vmatprep.mubr.msk.f32.mxu0 %vm437_vm0, %v430_v36 }
  0x51   : > { %539 = vmatmul.mubr.f32.gmra.mrb[6].mxu0 %v429_v37 }
  0x52   : > { %1675 = vmatprep.mubr.msk.f32.mxu0 %vm437_vm0, %v432_v38  ;;  %v687_v38 = vld [vmem:[%s3056_s7 + $0x10] sm:$0xff] }
  0x55   : > { %544 = vmatmul.mubr.f32.gmra.mrb[8].mxu0 %v431_v39 }
  0x56   : > { %1676 = vmatprep.mubr.msk.f32.mxu0 %vm437_vm0, %v434_v40 }
  0x59   : > { %549 = vmatmul.mubr.f32.gmra.mrb[10].mxu0 %v433_v41 }
  0x5a   : > { %1677 = vmatprep.mubr.msk.f32.mxu0 %vm437_vm0, %v436_v42 }
  0x5d   : > { %554 = vmatmul.mubr.f32.gmra.mrb[12].mxu0 %v435_v43  ;;  %v688_v43 = vld [vmem:[%s3056_s7 + $0x18] sm:$0xff] }
  0x5e   : > { %1941 = vmatprep.mubr.msk.f32.mxu0 %vm2301_vm1, %v2300_v30 }
 0x118   : > { %v2570_v44 = vpop.f32.mrb[0].mxu0 }
 0x119   : > { %v527_v45 = vpop.f32.mrb[1].mxu0  ;;  %1843 = vmatmul.mubr.msk.f32.vlgmr.msra.gmra.mrb[0].mxu1 %vm563_vm2, %v2570_v44 }
 0x11a   : > { %1845 = vmatprep.mubr.msk.f32.mxu1 %vm2301_vm1, %v2300_v30 }
 0x11c   : > { %v2576_v46 = vpop.f32.mrb[2].mxu0 }
 0x11d   : > { %v2108_v47 = vpack.c.bf16 %v2576_v46, %v2570_v44  ;;  %v532_v48 = vpop.f32.mrb[3].mxu0  ;;  %1846 = vmatmul.mubr.msk.f32.gmra.mrb[2].mxu1 %vm563_vm2, %v2576_v46 }
 0x11e   : > { %1848 = vmatprep.mubr.msk.f32.mxu1 %vm2301_vm1, %v2300_v30 }
 0x120   : > { %v2584_v49 = vpop.f32.mrb[4].mxu0 }
 0x121   : > { %v537_v50 = vpop.f32.mrb[5].mxu0  ;;  %1849 = vmatmul.mubr.msk.f32.gmra.mrb[4].mxu1 %vm563_vm2, %v2584_v49 }
 0x122   : > { %1851 = vmatprep.mubr.msk.f32.mxu1 %vm2301_vm1, %v2300_v30 }
 0x124   : > { %v2590_v51 = vpop.f32.mrb[6].mxu0 }
 0x125   : > { %v2111_v52 = vpack.c.bf16 %v2590_v51, %v2584_v49  ;;  %v542_v53 = vpop.f32.mrb[7].mxu0  ;;  %1852 = vmatmul.mubr.msk.f32.gmra.mrb[6].mxu1 %vm563_vm2, %v2590_v51 }
 0x126   : > { %1854 = vmatprep.mubr.msk.f32.mxu1 %vm2301_vm1, %v2300_v30 }
 0x128   : > { %v2598_v54 = vpop.f32.mrb[8].mxu0 }
 0x129   : > { %v547_v55 = vpop.f32.mrb[9].mxu0  ;;  %1855 = vmatmul.mubr.msk.f32.gmra.mrb[8].mxu1 %vm563_vm2, %v2598_v54 }
 0x12a   : > { %1857 = vmatprep.mubr.msk.f32.mxu1 %vm2301_vm1, %v2300_v30 }
 0x12c   : > { %v2604_v56 = vpop.f32.mrb[10].mxu0 }
 0x12d   : > { %v2114_v57 = vpack.c.bf16 %v2604_v56, %v2598_v54  ;;  %v552_v58 = vpop.f32.mrb[11].mxu0  ;;  %1858 = vmatmul.mubr.msk.f32.gmra.mrb[10].mxu1 %vm563_vm2, %v2604_v56 }
 0x12e   : > { %1860 = vmatprep.mubr.msk.f32.mxu1 %vm2301_vm1, %v2300_v30 }
 0x130   : > { %v2612_v59 = vpop.f32.mrb[12].mxu0 }
 0x131   : > { %v557_v60 = vpop.f32.mrb[13].mxu0  ;;  %1861 = vmatmul.mubr.msk.f32.gmra.mrb[12].mxu1 %vm563_vm2, %v2612_v59 }
 0x132   : > { %1877 = vmatprep.mubr.msk.f32.mxu1 %vm2301_vm1, %v2300_v30  ;;  %v690_v60 = vld [vmem:[%s3056_s7 + $0x28] sm:$0xff] }
 0x1ec   : > { %v651_v61 = vpop.f32.mrb[0].mxu1 }
 0x1ed   : > { %v1844_v62 = vpop.f32.mrb[1].mxu1 }
 0x1f0   : > { %v656_v63 = vpop.f32.mrb[2].mxu1 }
 0x1f1   : > { %v1847_v1 = vpop.f32.mrb[3].mxu1  ;;  %v2192_v2 = vpack.i.bf16 %v656_v63, %v651_v61 }
 0x1f3   : > { %2193 = vrot.lane.b32.xlu0 %v2192_v2, %s2302_s18  ;;  %v691_v2 = vld [vmem:[%s3056_s7 + $0x30] sm:$0xff] }
 0x1f4   : > { %v661_v3 = vpop.f32.mrb[4].mxu1 }
 0x1f5   : > { %v1850_v4 = vpop.f32.mrb[5].mxu1 }
 0x1f8   : > { %v666_v5 = vpop.f32.mrb[6].mxu1 }
 0x1f9   : > { %v2197_v6 = vpack.i.bf16 %v666_v5, %v661_v3  ;;  %v1853_v7 = vpop.f32.mrb[7].mxu1 }
 0x1fb   : > { %2198 = vrot.lane.b32.xlu0 %v2197_v6, %s2302_s18 }
 0x1fc   : > { %v671_v8 = vpop.f32.mrb[8].mxu1 }
 0x1fd   : > { %v1856_v9 = vpop.f32.mrb[9].mxu1 }
 0x200   : > { %v676_v10 = vpop.f32.mrb[10].mxu1 }
 0x201   : > { %v1859_v11 = vpop.f32.mrb[11].mxu1  ;;  %v2202_v12 = vpack.i.bf16 %v676_v10, %v671_v8 }
 0x203   : > { %2203 = vrot.lane.b32.xlu1 %v2202_v12, %s2302_s18 }
 0x204   : > { %v681_v13 = vpop.f32.mrb[12].mxu1 }
 0x205   : > { %v1862_v14 = vpop.f32.mrb[13].mxu1 }
 0x207   : > { %711 = vrot.lane.b32.xlu1 %v681_v13, %s2302_s18  ;;  %s2739_s18 = scalar_lea.vmem [#allocation2], %s2145_s28  ;;  %s2963_s28 = scalar_lea.sflag [#allocation3], %s332_s27 }
 0x208   : > { %s1578_s22 = sshll.u32 %s2739_s18, 4  ;;  %s2959_s22 = int_to_ptr.vmem [resolvable:$true] %s1578_s22 }
 0x209   : > { %s2235_s29 = scalar_lea.vmem %s2959_s22, 896 }
 0x20a   : > { %p2236_p11 = scmp.ne.s32.totalorder %s2959_s22, %s2235_s29 }
 0x20c   : > { %p2237_p12 = pnand %p2236_p11, %p2394_p5 }
 0x20e   : > { %p2238_p13 = pneg %p2237_p12 }
 0x265   : > { %v2194_v15 = vpop.permute.xlu0 %2193 }
 0x266   : > { %v2196_v16 = vunpack.i.h.bf16 %v2194_v15  ;;  %v2195_v17 = vunpack.i.l.bf16 %v2194_v15 }
 0x268   : > { %v2096_v18 = vpack.c.bf16 %v2196_v16, %v2195_v17 }
 0x26a   : > { %2098 = vmatpush3.bf16.xpose.msk.msra.mxu1 %vm2097_vm4, %v2096_v18 }
 0x26b   : > { %2099 = vmatprep.subr.bf16.mxu1 %v2299_v0 }
 0x26d   : > { %v2199_v19 = vpop.permute.xlu0 %2198 }
 0x26e   : > { %v2201_v20 = vunpack.i.h.bf16 %v2199_v19  ;;  %v2200_v21 = vunpack.i.l.bf16 %v2199_v19 }
 0x270   : > { %v2100_v22 = vpack.c.bf16 %v2201_v20, %v2200_v21 }
 0x272   : > { %2102 = vmatpush3.bf16.xpose.msk.msra.mxu1 %vm2097_vm4, %v2100_v22 }
 0x273   : > { %2103 = vmatprep.subr.bf16.mxu1 %v2299_v0 }
 0x275   : > { %v2204_v23 = vpop.permute.xlu1 %2203 }
 0x276   : > { %v2206_v24 = vunpack.i.h.bf16 %v2204_v23  ;;  %v2205_v25 = vunpack.i.l.bf16 %v2204_v23 }
 0x278   : > { %v2104_v26 = vpack.c.bf16 %v2206_v24, %v2205_v25 }
 0x279   : > { %v712_v27 = vpop.permute.xlu1 %711 }
 0x27a   : > { %2106 = vmatpush3.bf16.xpose.msk.msra.mxu1 %vm2097_vm4, %v2104_v26 }
 0x27b   : > { %1875 = vmatprep.subr.mxu1 %v2300_v30 }
 0x282   : > { %1876 = vmatpush3.xpose.msk.msra.mxu1 %vm713_vm3, %v712_v27 }
 0x283   : > { %2107 = vmatprep.subr.bf16.mxu1 %v2299_v0 }
 0x285   : > { %1878 = vmatmul.mubr.msk.f32.vlgmr.msra.gmra.mrb[14].mxu1 %vm713_vm3, %v651_v61 }
 0x286   : > { %2109 = vmatpush3.bf16.msra.mxu1 %v2108_v47  ;;  %1880 = vmatprep.mubr.msk.f32.mxu1 %vm2301_vm1, %v2300_v30 }
 0x287   : > { %2110 = vmatprep.subr.bf16.mxu1 %v2299_v0 }
 0x289   : > { %1881 = vmatmul.mubr.msk.f32.gmra.mrb[16].mxu1 %vm713_vm3, %v656_v63 }
 0x28a   : > { %2112 = vmatpush3.bf16.msra.mxu1 %v2111_v52  ;;  %1883 = vmatprep.mubr.msk.f32.mxu1 %vm2301_vm1, %v2300_v30  ;;  %v689_v52 = vld [vmem:[%s3056_s7 + $0x20] sm:$0xff] }
 0x28b   : > { %2113 = vmatprep.subr.bf16.mxu1 %v2299_v0 }
 0x28d   : > { %1884 = vmatmul.mubr.msk.f32.gmra.mrb[18].mxu1 %vm713_vm3, %v661_v3 }
 0x28e   : > { %2115 = vmatpush3.bf16.msra.mxu1 %v2114_v57  ;;  %1886 = vmatprep.mubr.msk.f32.mxu1 %vm2301_vm1, %v2300_v30 }
 0x28f   : > { %1910 = vmatprep.subr.mxu1 %v2300_v30 }
 0x291   : > { %1887 = vmatmul.mubr.msk.f32.gmra.mrb[20].mxu1 %vm713_vm3, %v666_v5 }
 0x292   : > { %1911 = vmatpush3.msra.mxu1 %v2612_v59  ;;  %1889 = vmatprep.mubr.msk.f32.mxu1 %vm2301_vm1, %v2300_v30 }
 0x293   : > { %2122 = vmatprep.subr.bf16.mxu1 %v2299_v0 }
 0x295   : > { %1890 = vmatmul.mubr.msk.f32.gmra.mrb[22].mxu1 %vm713_vm3, %v671_v8 }
 0x296   : > { %1892 = vmatprep.mubr.msk.f32.mxu1 %vm2301_vm1, %v2300_v30 }
 0x299   : > { %1893 = vmatmul.mubr.msk.f32.gmra.mrb[24].mxu1 %vm713_vm3, %v676_v10 }
 0x29a   : > { %1895 = vmatprep.mubr.msk.f32.mxu1 %vm2301_vm1, %v2300_v30 }
 0x29d   : > { %1896 = vmatmul.mubr.msk.f32.gmra.mrb[26].mxu1 %vm713_vm3, %v681_v13 }
 0x29e   : > { %1912 = vmatprep.mubr.msk.f32.mxu1 %vm2301_vm1, %v2300_v30 }
 0x358   : > { %v808_v29 = vpop.f32.mrb[14].mxu1 }
 0x359   : > { %v809_v31 = vadd.f32 %v808_v29, %v685_v28  ;;  %v1879_v32 = vpop.f32.mrb[15].mxu1 }
 0x35b   : > { %v843_v34 = vsel %vm842_vm5, %v809_v31, -inf }
 0x35c   : > { %844 = vmax.xlane.f32.xlu0 %v843_v34  ;;  %v813_v35 = vpop.f32.mrb[16].mxu1 }
 0x35d   : > { %v814_v36 = vadd.f32 %v813_v35, %v686_v33  ;;  %v1882_v37 = vpop.f32.mrb[17].mxu1 }
 0x35f   : > { %v846_v39 = vsel %vm842_vm5, %v814_v36, -inf }
 0x360   : > { %847 = vmax.xlane.f32.xlu1 %v846_v39  ;;  %v818_v40 = vpop.f32.mrb[18].mxu1 }
 0x361   : > { %v819_v41 = vadd.f32 %v818_v40, %v687_v38  ;;  %v1885_v42 = vpop.f32.mrb[19].mxu1 }
 0x363   : > { %v849_v45 = vsel %vm842_vm5, %v819_v41, -inf }
 0x364   : > { %850 = vmax.xlane.f32.xlu0 %v849_v45  ;;  %v823_v47 = vpop.f32.mrb[20].mxu1  ;;  %v1706_v45 = vld [vmem:[%s3054_s5 + $0x20] sm:$0xff] }
 0x365   : > { %v824_v48 = vadd.f32 %v823_v47, %v688_v43  ;;  %v1888_v50 = vpop.f32.mrb[21].mxu1  ;;  %v1707_v47 = vld [vmem:[%s3054_s5 + $0x28] sm:$0xff] }
 0x366   : > { %v2117_v50 = vpack.c.bf16 %v1707_v47, %v1706_v45 }
 0x367   : > { %v852_v53 = vsel %vm842_vm5, %v824_v48, -inf }
 0x368   : > { %853 = vmax.xlane.f32.xlu0 %v852_v53  ;;  %v828_v55 = vpop.f32.mrb[22].mxu1  ;;  %2118 = vmatpush3.bf16.msra.mxu0 %v2117_v50 }
 0x369   : > { %v829_v57 = vadd.f32 %v828_v55, %v689_v52  ;;  %v1891_v58 = vpop.f32.mrb[23].mxu1  ;;  %v1709_v52 = vld [vmem:[%s3054_s5 + $0x38] sm:$0xff]  ;;  %2119 = vmatprep.subr.bf16.mxu0 %v2299_v0 }
 0x36b   : > { %v855_v61 = vsel %vm842_vm5, %v829_v57, -inf }
 0x36c   : > { %856 = vmax.xlane.f32.xlu1 %v855_v61  ;;  %v833_v62 = vpop.f32.mrb[24].mxu1  ;;  %v928_v61 = vld [vmem:[%s3054_s5 + $0x8] sm:$0xff] }
 0x36d   : > { %v834_v63 = vadd.f32 %v833_v62, %v690_v60  ;;  %v1894_v1 = vpop.f32.mrb[25].mxu1  ;;  %v927_v60 = vld [vmem:[%s3054_s5] sm:$0xff] }
 0x36f   : > { %v858_v3 = vsel %vm842_vm5, %v834_v63, -inf }
 0x370   : > { %859 = vmax.xlane.f32.xlu0 %v858_v3  ;;  %v838_v4 = vpop.f32.mrb[26].mxu1  ;;  %v929_v3 = vld [vmem:[%s3054_s5 + $0x10] sm:$0xff] }
 0x371   : > { %v839_v5 = vadd.f32 %v838_v4, %v691_v2  ;;  %v1897_v6 = vpop.f32.mrb[27].mxu1  ;;  %v930_v4 = vld [vmem:[%s3054_s5 + $0x18] sm:$0xff] }
 0x372   : > { %v2126_v6 = vpack.c.bf16 %v930_v4, %v929_v3 }
 0x373   : > { %v861_v7 = vsel %vm842_vm5, %v839_v5, -inf }
 0x374   : > { %862 = vmax.xlane.f32.xlu1 %v861_v7 }
 0x3e9   : > { %v845_v8 = vpop.xlane.xlu0 %844 }
 0x3ea   : > { %v864_v9 = vsub.f32 %v809_v31, %v845_v8 }
 0x3ec   : > { %v871_v10 = vmul.f32 1.442695, %v864_v9 }
 0x3ed   : > { %v848_v11 = vpop.xlane.xlu1 %847 }
 0x3ee   : > { %2207 = vpow2.f32 %v871_v10  ;;  %v865_v12 = vsub.f32 %v814_v36, %v848_v11 }
 0x3f0   : > { %v873_v13 = vmul.f32 1.442695, %v865_v12 }
 0x3f1   : > { %v851_v14 = vpop.xlane.xlu0 %850 }
 0x3f2   : > { %2209 = vpow2.f32 %v873_v13  ;;  %v866_v15 = vsub.f32 %v819_v41, %v851_v14 }
 0x3f4   : > { %v875_v16 = vmul.f32 1.442695, %v866_v15 }
 0x3f5   : > { %v854_v17 = vpop.xlane.xlu0 %853 }
 0x3f6   : > { %2211 = vpow2.f32 %v875_v16  ;;  %v867_v18 = vsub.f32 %v824_v48, %v854_v17  ;;  %v1708_v48 = vld [vmem:[%s3054_s5 + $0x30] sm:$0xff] }
 0x3f7   : > { %v2120_v53 = vpack.c.bf16 %v1709_v52, %v1708_v48  ;;  %v1724_v48 = vld [vmem:[%s3055_s6] ss:$0 sm:$0xff] }
 0x3f8   : > { %v2208_v19 = vpop.eup %2207  ;;  %v877_v20 = vmul.f32 1.442695, %v867_v18 }
 0x3f9   : > { %v857_v21 = vpop.xlane.xlu1 %856  ;;  %v885_v22 = vsel %vm842_vm5, %v2208_v19, 0.0  ;;  %2121 = vmatpush3.bf16.msra.mxu0 %v2120_v53 }
 0x3fa   : > { %2213 = vpow2.f32 %v877_v20  ;;  %v868_v23 = vsub.f32 %v829_v57, %v857_v21  ;;  %886 = vadd.xlane.f32.xlu0 %v885_v22  ;;  %2128 = vmatprep.subr.bf16.mxu0 %v2299_v0 }
 0x3fc   : > { %v2686_v24 = vpop.eup %2209  ;;  %v879_v25 = vmul.f32 1.442695, %v868_v23 }
 0x3fd   : > { %v860_v26 = vpop.xlane.xlu0 %859  ;;  %v888_v27 = vsel %vm842_vm5, %v2686_v24, 0.0 }
 0x3fe   : > { %2215 = vpow2.f32 %v879_v25  ;;  %v869_v28 = vsub.f32 %v834_v63, %v860_v26  ;;  %889 = vadd.xlane.f32.xlu1 %v888_v27  ;;  %v2123_v63 = vpack.c.bf16 %v928_v61, %v927_v60 }
 0x400   : > { %v2690_v29 = vpop.eup %2211  ;;  %v881_v31 = vmul.f32 1.442695, %v869_v28 }
 0x401   : > { %v863_v32 = vpop.xlane.xlu1 %862  ;;  %v891_v33 = vsel %vm842_vm5, %v2690_v29, 0.0 }
 0x402   : > { %2217 = vpow2.f32 %v881_v31  ;;  %v870_v34 = vsub.f32 %v839_v5, %v863_v32  ;;  %892 = vadd.xlane.f32.xlu0 %v891_v33 }
 0x404   : > { %v2694_v35 = vpop.eup %2213  ;;  %v883_v36 = vmul.f32 1.442695, %v870_v34 }
 0x405   : > { %v894_v37 = vsel %vm842_vm5, %v2694_v35, 0.0 }
 0x406   : > { %2219 = vpow2.f32 %v883_v36  ;;  %895 = vadd.xlane.f32.xlu1 %v894_v37 }
 0x408   : > { %v2698_v38 = vpop.eup %2215 }
 0x409   : > { %v897_v39 = vsel %vm842_vm5, %v2698_v38, 0.0 }
 0x40a   : > { %898 = vadd.xlane.f32.xlu0 %v897_v39 }
 0x40c   : > { %v2702_v40 = vpop.eup %2217 }
 0x40d   : > { %v900_v41 = vsel %vm842_vm5, %v2702_v40, 0.0 }
 0x40e   : > { %901 = vadd.xlane.f32.xlu1 %v900_v41 }
 0x410   : > { %v2706_v42 = vpop.eup %2219 }
 0x411   : > { %v903_v43 = vsel %vm842_vm5, %v2706_v42, 0.0 }
 0x412   : > { %904 = vadd.xlane.f32.xlu0 %v903_v43 }
 0x487   : > { %v887_v55 = vpop.xlane.xlu0 %886 }
 0x488   : > { %2221 = vrcp.f32 %v887_v55 }
 0x48b   : > { %v890_v57 = vpop.xlane.xlu1 %889 }
 0x48c   : > { %2223 = vrcp.f32 %v890_v57 }
 0x48f   : > { %v893_v58 = vpop.xlane.xlu0 %892 }
 0x490   : > { %2225 = vrcp.f32 %v893_v58 }
 0x492   : > { %v2222_v62 = vpop.eup %2221 }
 0x493   : > { %v913_v1 = vmul.f32 %v2222_v62, %v2208_v19  ;;  %v896_v2 = vpop.xlane.xlu1 %895 }
 0x494   : > { %2227 = vrcp.f32 %v896_v2 }
 0x495   : > { %920 = vst.msk [vmem:[%s2739_s18] sm:$0xff] %vm842_vm5, %v913_v1  ;;  %1913 = vmatmul.mubr.msk.f32.vlgmr.msra.gmra.mrb[28].mxu1 %vm842_vm5, %v913_v1 }
 0x496   : > { %v2224_v5 = vpop.eup %2223  ;;  %1915 = vmatprep.mubr.msk.f32.mxu1 %vm2301_vm1, %v2300_v30  ;;  %2124 = vmatpush3.bf16.msra.mxu1 %v2123_v63 }
 0x497   : > { %v899_v7 = vpop.xlane.xlu0 %898  ;;  %v914_v8 = vmul.f32 %v2224_v5, %v2686_v24  ;;  %2125 = vmatprep.subr.bf16.mxu1 %v2299_v0 }
 0x498   : > { %2229 = vrcp.f32 %v899_v7 }
 0x499   : > { %921 = vst.msk [vmem:[%s2739_s18 + $0x8] sm:$0xff] %vm842_vm5, %v914_v8  ;;  %1916 = vmatmul.mubr.msk.f32.gmra.mrb[30].mxu1 %vm842_vm5, %v914_v8 }
 0x49a   : > { %v2226_v9 = vpop.eup %2225  ;;  %1918 = vmatprep.mubr.msk.f32.mxu1 %vm2301_vm1, %v2300_v30  ;;  %2127 = vmatpush3.bf16.msra.mxu1 %v2126_v6 }
 0x49b   : > { %v902_v10 = vpop.xlane.xlu1 %901  ;;  %v915_v11 = vmul.f32 %v2226_v9, %v2690_v29  ;;  %2137 = vmatprep.subr.bf16.mxu1 %v2299_v0 }
 0x49c   : > { %2231 = vrcp.f32 %v902_v10 }
 0x49d   : > { %922 = vst.msk [vmem:[%s2739_s18 + $0x10] sm:$0xff] %vm842_vm5, %v915_v11  ;;  %1919 = vmatmul.mubr.msk.f32.gmra.mrb[32].mxu1 %vm842_vm5, %v915_v11 }
 0x49e   : > { %v2228_v12 = vpop.eup %2227  ;;  %1921 = vmatprep.mubr.msk.f32.mxu1 %vm2301_vm1, %v2300_v30 }
 0x49f   : > { %v905_v13 = vpop.xlane.xlu0 %904  ;;  %v916_v14 = vmul.f32 %v2228_v12, %v2694_v35 }
 0x4a0   : > { %2233 = vrcp.f32 %v905_v13 }
 0x4a1   : > { %923 = vst.msk [vmem:[%s2739_s18 + $0x18] sm:$0xff] %vm842_vm5, %v916_v14  ;;  %1922 = vmatmul.mubr.msk.f32.gmra.mrb[34].mxu1 %vm842_vm5, %v916_v14 }
 0x4a2   : > { %v2230_v15 = vpop.eup %2229  ;;  %1924 = vmatprep.mubr.msk.f32.mxu1 %vm2301_vm1, %v2300_v30 }
 0x4a3   : > { %v917_v16 = vmul.f32 %v2230_v15, %v2698_v38 }
 0x4a5   : > { %924 = vst.msk [vmem:[%s2739_s18 + $0x20] sm:$0xff] %vm842_vm5, %v917_v16  ;;  %1925 = vmatmul.mubr.msk.f32.gmra.mrb[36].mxu1 %vm842_vm5, %v917_v16 }
 0x4a6   : > { %v2232_v17 = vpop.eup %2231  ;;  %1927 = vmatprep.mubr.msk.f32.mxu1 %vm2301_vm1, %v2300_v30 }
 0x4a7   : > { %v918_v18 = vmul.f32 %v2232_v17, %v2702_v40 }
 0x4a9   : > { %925 = vst.msk [vmem:[%s2739_s18 + $0x28] sm:$0xff] %vm842_vm5, %v918_v18  ;;  %1928 = vmatmul.mubr.msk.f32.gmra.mrb[38].mxu1 %vm842_vm5, %v918_v18 }
 0x4aa   : > { %v2234_v19 = vpop.eup %2233  ;;  %1930 = vmatprep.mubr.msk.f32.mxu1 %vm2301_vm1, %v2300_v30 }
 0x4ab   : > { %v919_v20 = vmul.f32 %v2234_v19, %v2706_v42 }
 0x4ad   : > { %926 = vst.msk [vmem:[%s2739_s18 + $0x30] sm:$0xff] %vm842_vm5, %v919_v20  ;;  %1931 = vmatmul.mubr.msk.f32.gmra.mrb[40].mxu1 %vm842_vm5, %v919_v20  ;;  %s2239_s18 = sshll.u32 %s2303_s13, 4  ;;  %s2240_s18 = int_to_ptr.vmem [resolvable:$false] %s2239_s18 }
 0x4ae   : > { %1970 = vmatprep.mubr.msk.f32.mxu1 %vm2301_vm1, %v2300_v30  ;;  %s2241_s14 = scalar_lea.vmem %s2240_s18, 1792  ;;  %p2242_p0 = scmp.lt.s32.totalorder %s2959_s22, %s2240_s18 }
 0x4af   : > { %p2243_p1 = scmp.lt.s32.totalorder %s2241_s14, %s2235_s29 }
 0x4b1   : > { %1971 = vmatmul.mubr.msk.f32.vlgmr.msra.gmra.mrb[42].mxu1 %vm563_vm2, %v2570_v44  ;;  %p2244_p2 = por %p2243_p1, %p2242_p0 }
 0x4b2   : > { %1973 = vmatprep.mubr.msk.f32.mxu1 %vm2301_vm1, %v2300_v30 }
 0x4b3   : > { %p2245_p3 = pnand %p2244_p2, %p2238_p13 }
 0x4b5   : > { %1974 = vmatmul.mubr.msk.f32.gmra.mrb[44].mxu1 %vm563_vm2, %v2576_v46 }
 0x4b6   : > { %1976 = vmatprep.mubr.msk.f32.mxu1 %vm2301_vm1, %v2300_v30 }
 0x4b9   : > { %1977 = vmatmul.mubr.msk.f32.gmra.mrb[46].mxu1 %vm563_vm2, %v2584_v49 }
 0x4ba   : > { %1979 = vmatprep.mubr.msk.f32.mxu1 %vm2301_vm1, %v2300_v30 }
 0x4bd   : > { %1980 = vmatmul.mubr.msk.f32.gmra.mrb[48].mxu1 %vm563_vm2, %v2590_v51 }
 0x4be   : > { %1982 = vmatprep.mubr.msk.f32.mxu1 %vm2301_vm1, %v2300_v30 }
 0x4c1   : > { %1983 = vmatmul.mubr.msk.f32.gmra.mrb[50].mxu1 %vm563_vm2, %v2598_v54 }
 0x4c2   : > { %1985 = vmatprep.mubr.msk.f32.mxu1 %vm2301_vm1, %v2300_v30 }
 0x4c5   : > { %1986 = vmatmul.mubr.msk.f32.gmra.mrb[52].mxu1 %vm563_vm2, %v2604_v56 }
 0x4c6   : > { %1988 = vmatprep.mubr.msk.f32.mxu1 %vm2301_vm1, %v2300_v30 }
 0x4c9   : > { %1989 = vmatmul.mubr.msk.f32.gmra.mrb[54].mxu1 %vm563_vm2, %v2612_v59 }
 0x4ca   : > { %2044 = vmatprep.mubr.msk.f32.mxu1 %vm2301_vm1, %v2300_v30 }
 0x568   : > { %v1018_v44 = vpop.f32.mrb[28].mxu1 }
 0x569   : > { %v1914_v46 = vpop.f32.mrb[29].mxu1  ;;  %1942 = vmatmul.mubr.msk.f32.vlgmr.msra.gmra.mrb[14].mxu0 %vm563_vm2, %v1018_v44 }
 0x56a   : > { %1944 = vmatprep.mubr.msk.f32.mxu0 %vm2301_vm1, %v2300_v30 }
 0x56c   : > { %v1023_v49 = vpop.f32.mrb[30].mxu1 }
 0x56d   : > { %v1917_v51 = vpop.f32.mrb[31].mxu1  ;;  %1945 = vmatmul.mubr.msk.f32.gmra.mrb[16].mxu0 %vm563_vm2, %v1023_v49 }
 0x56e   : > { %1947 = vmatprep.mubr.msk.f32.mxu0 %vm2301_vm1, %v2300_v30 }
 0x570   : > { %v1028_v54 = vpop.f32.mrb[32].mxu1 }
 0x571   : > { %v1920_v56 = vpop.f32.mrb[33].mxu1  ;;  %1948 = vmatmul.mubr.msk.f32.gmra.mrb[18].mxu0 %vm563_vm2, %v1028_v54 }
 0x572   : > { %1950 = vmatprep.mubr.msk.f32.mxu0 %vm2301_vm1, %v2300_v30  ;;  %v1299_v56 = vld [vmem:[%s3052_s3] sm:$0xff] }
 0x574   : > { %v1033_v59 = vpop.f32.mrb[34].mxu1 }
 0x575   : > { %v1923_v21 = vpop.f32.mrb[35].mxu1  ;;  %1951 = vmatmul.mubr.msk.f32.gmra.mrb[20].mxu0 %vm563_vm2, %v1033_v59  ;;  %v1300_v59 = vld [vmem:[%s3052_s3 + $0x8] sm:$0xff] }
 0x576   : > { %1953 = vmatprep.mubr.msk.f32.mxu0 %vm2301_vm1, %v2300_v30  ;;  %v1313_v21 = vld [vmem:[%s3052_s3 + $0x70] sm:$0xff] }
 0x578   : > { %v1038_v22 = vpop.f32.mrb[36].mxu1 }
 0x579   : > { %v1926_v23 = vpop.f32.mrb[37].mxu1  ;;  %1954 = vmatmul.mubr.msk.f32.gmra.mrb[22].mxu0 %vm563_vm2, %v1038_v22  ;;  %v1301_v22 = vld [vmem:[%s3052_s3 + $0x10] sm:$0xff] }
 0x57a   : > { %1956 = vmatprep.mubr.msk.f32.mxu0 %vm2301_vm1, %v2300_v30  ;;  %v1314_v23 = vld [vmem:[%s3052_s3 + $0x78] sm:$0xff] }
 0x57c   : > { %v1043_v24 = vpop.f32.mrb[38].mxu1 }
 0x57d   : > { %v1929_v25 = vpop.f32.mrb[39].mxu1  ;;  %1957 = vmatmul.mubr.msk.f32.gmra.mrb[24].mxu0 %vm563_vm2, %v1043_v24  ;;  %v1302_v24 = vld [vmem:[%s3052_s3 + $0x18] sm:$0xff] }
 0x57e   : > { %1959 = vmatprep.mubr.msk.f32.mxu0 %vm2301_vm1, %v2300_v30  ;;  %v1315_v25 = vld [vmem:[%s3052_s3 + $0x80] sm:$0xff] }
 0x580   : > { %v1048_v26 = vpop.f32.mrb[40].mxu1 }
 0x581   : > { %v1932_v27 = vpop.f32.mrb[41].mxu1  ;;  %1960 = vmatmul.mubr.msk.f32.gmra.mrb[26].mxu0 %vm563_vm2, %v1048_v26  ;;  %v1303_v26 = vld [vmem:[%s3052_s3 + $0x20] sm:$0xff] }
 0x582   : > { %2005 = vmatprep.mubr.msk.f32.mxu0 %vm2301_vm1, %v2300_v30  ;;  %v1316_v27 = vld [vmem:[%s3052_s3 + $0x88] sm:$0xff] }
 0x584   : > { %v1244_v28 = vpop.f32.mrb[42].mxu1 }
 0x585   : > { %v1972_v29 = vpop.f32.mrb[43].mxu1 }
 0x586   : > { %v1317_v29 = vld [vmem:[%s3052_s3 + $0x90] sm:$0xff] }
 0x588   : > { %v1249_v31 = vpop.f32.mrb[44].mxu1 }
 0x589   : > { %v1975_v32 = vpop.f32.mrb[45].mxu1 }
 0x58a   : > { %v1306_v32 = vld [vmem:[%s3052_s3 + $0x38] sm:$0xff] }
 0x58c   : > { %v1254_v33 = vpop.f32.mrb[46].mxu1 }
 0x58d   : > { %v1978_v34 = vpop.f32.mrb[47].mxu1 }
 0x58e   : > { %v1308_v34 = vld [vmem:[%s3052_s3 + $0x48] sm:$0xff] }
 0x590   : > { %v1259_v35 = vpop.f32.mrb[48].mxu1 }
 0x591   : > { %v1981_v36 = vpop.f32.mrb[49].mxu1 }
 0x592   : > { %v1310_v36 = vld [vmem:[%s3052_s3 + $0x58] sm:$0xff] }
 0x594   : > { %v1264_v37 = vpop.f32.mrb[50].mxu1 }
 0x595   : > { %v1984_v38 = vpop.f32.mrb[51].mxu1 }
 0x598   : > { %v1269_v39 = vpop.f32.mrb[52].mxu1 }
 0x599   : > { %v1987_v40 = vpop.f32.mrb[53].mxu1 }
 0x59c   : > { %v1274_v41 = vpop.f32.mrb[54].mxu1 }
 0x59d   : > { %v1990_v42 = vpop.f32.mrb[55].mxu1 }
 0x63c   : > { %v1144_v43 = vpop.f32.mrb[14].mxu0 }
 0x63d   : > { %v1245_v45 = vadd.f32 %v1244_v28, %v1144_v43  ;;  %v1943_v47 = vpop.f32.mrb[15].mxu0  ;;  %v1304_v28 = vld [vmem:[%s3052_s3 + $0x28] sm:$0xff] }
 0x63f   : > { %v1285_v52 = vadd.f32 %v1724_v48, %v1245_v45 }
 0x640   : > { %v1149_v50 = vpop.f32.mrb[16].mxu0 }
 0x641   : > { %v1250_v53 = vadd.f32 %v1249_v31, %v1149_v50  ;;  %v1946_v55 = vpop.f32.mrb[17].mxu0  ;;  %v1292_v60 = vmax.f32 %v1285_v52, 0.0  ;;  %v1305_v31 = vld [vmem:[%s3052_s3 + $0x30] sm:$0xff] }
 0x643   : > { %v1286_v57 = vadd.f32 %v1724_v48, %v1250_v53 }
 0x644   : > { %v1154_v58 = vpop.f32.mrb[18].mxu0 }
 0x645   : > { %v1293_v61 = vmax.f32 %v1286_v57, 0.0  ;;  %v1255_v62 = vadd.f32 %v1254_v33, %v1154_v58  ;;  %v1949_v63 = vpop.f32.mrb[19].mxu0  ;;  %v1307_v33 = vld [vmem:[%s3052_s3 + $0x40] sm:$0xff] }
 0x647   : > { %v2129_v1 = vpack.c.bf16 %v1293_v61, %v1292_v60  ;;  %v1287_v3 = vadd.f32 %v1724_v48, %v1255_v62 }
 0x648   : > { %v1159_v2 = vpop.f32.mrb[20].mxu0 }
 0x649   : > { %v1260_v4 = vadd.f32 %v1259_v35, %v1159_v2  ;;  %v1952_v5 = vpop.f32.mrb[21].mxu0  ;;  %2130 = vmatpush3.bf16.msra.mxu0 %v2129_v1  ;;  %2141 = vmatpush3.bf16.msra.mxu1 %v2129_v1  ;;  %v1294_v8 = vmax.f32 %v1287_v3, 0.0  ;;  %v1309_v35 = vld [vmem:[%s3052_s3 + $0x50] sm:$0xff] }
 0x64a   : > { %2131 = vmatprep.subr.bf16.mxu0 %v2299_v0  ;;  %2138 = vmatprep.subr.bf16.mxu1 %v2299_v0 }
 0x64b   : > { %v1288_v6 = vadd.f32 %v1724_v48, %v1260_v4 }
 0x64c   : > { %v1164_v7 = vpop.f32.mrb[22].mxu0 }
 0x64d   : > { %v1295_v9 = vmax.f32 %v1288_v6, 0.0  ;;  %v1265_v10 = vadd.f32 %v1264_v37, %v1164_v7  ;;  %v1955_v11 = vpop.f32.mrb[23].mxu0  ;;  %v1311_v37 = vld [vmem:[%s3052_s3 + $0x60] sm:$0xff] }
 0x64f   : > { %v2132_v12 = vpack.c.bf16 %v1295_v9, %v1294_v8  ;;  %v1289_v14 = vadd.f32 %v1724_v48, %v1265_v10 }
 0x650   : > { %v1169_v13 = vpop.f32.mrb[24].mxu0 }
 0x651   : > { %v1270_v15 = vadd.f32 %v1269_v39, %v1169_v13  ;;  %v1958_v16 = vpop.f32.mrb[25].mxu0  ;;  %2133 = vmatpush3.bf16.msra.mxu0 %v2132_v12  ;;  %2142 = vmatpush3.bf16.msra.mxu1 %v2132_v12  ;;  %v1296_v19 = vmax.f32 %v1289_v14, 0.0 }
 0x652   : > { %2134 = vmatprep.subr.bf16.mxu0 %v2299_v0  ;;  %2139 = vmatprep.subr.bf16.mxu1 %v2299_v0  ;;  %v1312_v0 = vld [vmem:[%s3052_s3 + $0x68] sm:$0xff] }
 0x653   : > { %v1290_v17 = vadd.f32 %v1724_v48, %v1270_v15 }
 0x654   : > { %v1174_v18 = vpop.f32.mrb[26].mxu0 }
 0x655   : > { %v1297_v20 = vmax.f32 %v1290_v17, 0.0  ;;  %v1275_v44 = vadd.f32 %v1274_v41, %v1174_v18  ;;  %v1961_v46 = vpop.f32.mrb[27].mxu0 }
 0x657   : > { %v2135_v49 = vpack.c.bf16 %v1297_v20, %v1296_v19  ;;  %v1291_v51 = vadd.f32 %v1724_v48, %v1275_v44 }
 0x659   : > { %2136 = vmatpush3.bf16.msra.mxu0 %v2135_v49  ;;  %2143 = vmatpush3.bf16.msra.mxu1 %v2135_v49  ;;  %v1298_v54 = vmax.f32 %v1291_v51, 0.0 }
 0x65a   : > { %2003 = vmatprep.subr.mxu0 %v2300_v30  ;;  %2140 = vmatprep.subr.mxu1 %v2300_v30 }
 0x65d   : > { %2004 = vmatpush3.msra.mxu0 %v1298_v54  ;;  %2144 = vmatpush3.msra.mxu1 %v1298_v54 }
 0x65e   : > { %2006 = vmatmul.mubr.msk.f32.vlgmr.msra.gmra.mrb[28].mxu0 %vm842_vm5, %v1299_v56  ;;  %2045 = vmatmul.mubr.msk.f32.vlgmr.msra.gmra.mrb[56].mxu1 %vm842_vm5, %v1312_v0 }
 0x65f   : > { %2008 = vmatprep.mubr.msk.f32.mxu0 %vm2301_vm1, %v2300_v30  ;;  %2047 = vmatprep.mubr.msk.f32.mxu1 %vm2301_vm1, %v2300_v30 }
 0x662   : > { %2009 = vmatmul.mubr.msk.f32.gmra.mrb[30].mxu0 %vm842_vm5, %v1300_v59  ;;  %2048 = vmatmul.mubr.msk.f32.gmra.mrb[58].mxu1 %vm842_vm5, %v1313_v21 }
 0x663   : > { %2011 = vmatprep.mubr.msk.f32.mxu0 %vm2301_vm1, %v2300_v30  ;;  %2050 = vmatprep.mubr.msk.f32.mxu1 %vm2301_vm1, %v2300_v30 }
 0x666   : > { %2012 = vmatmul.mubr.msk.f32.gmra.mrb[32].mxu0 %vm842_vm5, %v1301_v22  ;;  %2051 = vmatmul.mubr.msk.f32.gmra.mrb[60].mxu1 %vm842_vm5, %v1314_v23 }
 0x667   : > { %2014 = vmatprep.mubr.msk.f32.mxu0 %vm2301_vm1, %v2300_v30  ;;  %2053 = vmatprep.mubr.msk.f32.mxu1 %vm2301_vm1, %v2300_v30 }
 0x66a   : > { %2015 = vmatmul.mubr.msk.f32.gmra.mrb[34].mxu0 %vm842_vm5, %v1302_v24  ;;  %2054 = vmatmul.mubr.msk.f32.gmra.mrb[62].mxu1 %vm842_vm5, %v1315_v25 }
 0x66b   : > { %2017 = vmatprep.mubr.msk.f32.mxu0 %vm2301_vm1, %v2300_v30  ;;  %2056 = vmatprep.mubr.msk.f32.mxu1 %vm2301_vm1, %v2300_v30 }
 0x66e   : > { %2018 = vmatmul.mubr.msk.f32.gmra.mrb[36].mxu0 %vm842_vm5, %v1303_v26  ;;  %2057 = vmatmul.mubr.msk.f32.gmra.mrb[64].mxu1 %vm842_vm5, %v1316_v27 }
 0x66f   : > { %2020 = vmatprep.mubr.msk.f32.mxu0 %vm2301_vm1, %v2300_v30  ;;  %2059 = vmatprep.mubr.msk.f32.mxu1 %vm2301_vm1, %v2300_v30 }
 0x672   : > { %2021 = vmatmul.mubr.msk.f32.gmra.mrb[38].mxu0 %vm842_vm5, %v1304_v28  ;;  %2060 = vmatmul.mubr.msk.f32.gmra.mrb[66].mxu1 %vm842_vm5, %v1317_v29 }
 0x673   : > { %2023 = vmatprep.mubr.msk.f32.mxu0 %vm2301_vm1, %v2300_v30 }
 0x676   : > { %2024 = vmatmul.mubr.msk.f32.gmra.mrb[40].mxu0 %vm842_vm5, %v1305_v31 }
 0x677   : > { %2026 = vmatprep.mubr.msk.f32.mxu0 %vm2301_vm1, %v2300_v30 }
 0x67a   : > { %2027 = vmatmul.mubr.msk.f32.gmra.mrb[42].mxu0 %vm842_vm5, %v1306_v32 }
 0x67b   : > { %2029 = vmatprep.mubr.msk.f32.mxu0 %vm2301_vm1, %v2300_v30 }
 0x67e   : > { %2030 = vmatmul.mubr.msk.f32.gmra.mrb[44].mxu0 %vm842_vm5, %v1307_v33 }
 0x67f   : > { %2032 = vmatprep.mubr.msk.f32.mxu0 %vm2301_vm1, %v2300_v30 }
 0x682   : > { %2033 = vmatmul.mubr.msk.f32.gmra.mrb[46].mxu0 %vm842_vm5, %v1308_v34 }
 0x683   : > { %2035 = vmatprep.mubr.msk.f32.mxu0 %vm2301_vm1, %v2300_v30 }
 0x686   : > { %2036 = vmatmul.mubr.msk.f32.gmra.mrb[48].mxu0 %vm842_vm5, %v1309_v35 }
 0x687   : > { %2038 = vmatprep.mubr.msk.f32.mxu0 %vm2301_vm1, %v2300_v30 }
 0x68a   : > { %2039 = vmatmul.mubr.msk.f32.gmra.mrb[50].mxu0 %vm842_vm5, %v1310_v36 }
 0x68b   : > { %2041 = vmatprep.mubr.msk.f32.mxu0 %vm2301_vm1, %v2300_v30 }
 0x68e   : > { %2042 = vmatmul.mubr.msk.f32.gmra.mrb[52].mxu0 %vm842_vm5, %v1311_v37 }
 0x68f   : > { %2248 = shalt.err (!%p2245_p3)
}
 0x690   : > { %s2249_s27 = scalar_lea.hbm %s2957_s26, 896  ;;  %s2253_s23 = scalar_lea.hbm %s3058_s9, 1792 }
 0x691   : > { %p2250_p4 = scmp.ne.s32.totalorder %s2957_s26, %s2249_s27  ;;  %p2254_p9 = scmp.lt.u32.totalorder %s2957_s26, %s3058_s9 }
 0x692   : > { %p2255_p10 = scmp.lt.u32.totalorder %s2253_s23, %s2249_s27  ;;  %p2257_p12 = scmp.lt.u32.totalorder %s2249_s27, %s2957_s26 }
 0x693   : > { %p2251_p7 = pnand %p2250_p4, %p2394_p5 }
 0x694   : > { %p2256_p11 = por %p2255_p10, %p2254_p9 }
 0x695   : > { %p2252_p8 = pneg %p2251_p7 }
 0x696   : > { %p2258_p13 = por %p2257_p12, %p2256_p11 }
 0x698   : > { %p2259_p0 = pnand %p2258_p13, %p2252_p8 }
 0x69a   : > { %2262 = shalt.err (!%p2259_p0)
}
 0x69b   : > { %s2304_s29 = smov 128   ;;  %s2305_s18 = smov 8   ;;  %vm1535_vm6 = vcmask 130048  }
 0x69c   : > { %2147 = dma.vmem_to_hbm [thread:$0]  (%p2394_p5), %s2959_s22, 896, %s2957_s26, %s2963_s28, %s2304_s29, %s2304_s29, %s2305_s18  }
 0x69d   : > { %s2992_s17 = scalar_lea.vmem %s3057_s8, %s1669_s24 }
 0x731   : > { %v1441_v30 = vpop.f32.mrb[28].mxu0  ;;  %v1506_v38 = vpop.f32.mrb[56].mxu1 }
 0x732   : > { %1536 = vst.msk [vmem:[%s2992_s17] sm:$0xff] %vm1535_vm6, %v1441_v30  ;;  %v2007_v39 = vpop.f32.mrb[29].mxu0  ;;  %1549 = vst.msk [vmem:[%s2992_s17 + $0x68] sm:$0xff] %vm1535_vm6, %v1506_v38  ;;  %v2046_v40 = vpop.f32.mrb[57].mxu1 }
 0x735   : > { %v1446_v41 = vpop.f32.mrb[30].mxu0  ;;  %v1511_v42 = vpop.f32.mrb[58].mxu1 }
 0x736   : > { %1537 = vst.msk [vmem:[%s2992_s17 + $0x8] sm:$0xff] %vm1535_vm6, %v1446_v41  ;;  %v2010_v43 = vpop.f32.mrb[31].mxu0  ;;  %1550 = vst.msk [vmem:[%s2992_s17 + $0x70] sm:$0xff] %vm1535_vm6, %v1511_v42  ;;  %v2049_v45 = vpop.f32.mrb[59].mxu1 }
 0x739   : > { %v1451_v47 = vpop.f32.mrb[32].mxu0  ;;  %v1516_v48 = vpop.f32.mrb[60].mxu1 }
 0x73a   : > { %1538 = vst.msk [vmem:[%s2992_s17 + $0x10] sm:$0xff] %vm1535_vm6, %v1451_v47  ;;  %v2013_v50 = vpop.f32.mrb[33].mxu0  ;;  %1551 = vst.msk [vmem:[%s2992_s17 + $0x78] sm:$0xff] %vm1535_vm6, %v1516_v48  ;;  %v2052_v52 = vpop.f32.mrb[61].mxu1 }
 0x73d   : > { %v1456_v53 = vpop.f32.mrb[34].mxu0  ;;  %v1521_v55 = vpop.f32.mrb[62].mxu1 }
 0x73e   : > { %1539 = vst.msk [vmem:[%s2992_s17 + $0x18] sm:$0xff] %vm1535_vm6, %v1456_v53  ;;  %v2016_v57 = vpop.f32.mrb[35].mxu0  ;;  %1552 = vst.msk [vmem:[%s2992_s17 + $0x80] sm:$0xff] %vm1535_vm6, %v1521_v55  ;;  %v2055_v58 = vpop.f32.mrb[63].mxu1 }
 0x741   : > { %v1461_v60 = vpop.f32.mrb[36].mxu0  ;;  %v1526_v61 = vpop.f32.mrb[64].mxu1 }
 0x742   : > { %1540 = vst.msk [vmem:[%s2992_s17 + $0x20] sm:$0xff] %vm1535_vm6, %v1461_v60  ;;  %v2019_v62 = vpop.f32.mrb[37].mxu0  ;;  %1553 = vst.msk [vmem:[%s2992_s17 + $0x88] sm:$0xff] %vm1535_vm6, %v1526_v61  ;;  %v2058_v63 = vpop.f32.mrb[65].mxu1 }
 0x745   : > { %v1466_v1 = vpop.f32.mrb[38].mxu0  ;;  %v1531_v2 = vpop.f32.mrb[66].mxu1 }
 0x746   : > { %1541 = vst.msk [vmem:[%s2992_s17 + $0x28] sm:$0xff] %vm1535_vm6, %v1466_v1  ;;  %v2022_v3 = vpop.f32.mrb[39].mxu0  ;;  %1554 = vst.msk [vmem:[%s2992_s17 + $0x90] sm:$0xff] %vm1535_vm6, %v1531_v2  ;;  %v2061_v4 = vpop.f32.mrb[67].mxu1 }
 0x749   : > { %v1471_v5 = vpop.f32.mrb[40].mxu0 }
 0x74a   : > { %1542 = vst.msk [vmem:[%s2992_s17 + $0x30] sm:$0xff] %vm1535_vm6, %v1471_v5  ;;  %v2025_v6 = vpop.f32.mrb[41].mxu0 }
 0x74d   : > { %v1476_v7 = vpop.f32.mrb[42].mxu0 }
 0x74e   : > { %1543 = vst.msk [vmem:[%s2992_s17 + $0x38] sm:$0xff] %vm1535_vm6, %v1476_v7  ;;  %v2028_v8 = vpop.f32.mrb[43].mxu0 }
 0x751   : > { %v1481_v9 = vpop.f32.mrb[44].mxu0 }
 0x752   : > { %1544 = vst.msk [vmem:[%s2992_s17 + $0x40] sm:$0xff] %vm1535_vm6, %v1481_v9  ;;  %v2031_v10 = vpop.f32.mrb[45].mxu0 }
 0x755   : > { %v1486_v11 = vpop.f32.mrb[46].mxu0 }
 0x756   : > { %1545 = vst.msk [vmem:[%s2992_s17 + $0x48] sm:$0xff] %vm1535_vm6, %v1486_v11  ;;  %v2034_v12 = vpop.f32.mrb[47].mxu0 }
 0x759   : > { %v1491_v13 = vpop.f32.mrb[48].mxu0 }
 0x75a   : > { %1546 = vst.msk [vmem:[%s2992_s17 + $0x50] sm:$0xff] %vm1535_vm6, %v1491_v13  ;;  %v2037_v14 = vpop.f32.mrb[49].mxu0 }
 0x75d   : > { %v1496_v15 = vpop.f32.mrb[50].mxu0 }
 0x75e   : > { %1547 = vst.msk [vmem:[%s2992_s17 + $0x58] sm:$0xff] %vm1535_vm6, %v1496_v15  ;;  %v2040_v16 = vpop.f32.mrb[51].mxu0 }
 0x761   : > { %v1501_v17 = vpop.f32.mrb[52].mxu0 }
 0x762   : > { %1548 = vst.msk [vmem:[%s2992_s17 + $0x60] sm:$0xff] %vm1535_vm6, %v1501_v17  ;;  %v2043_v18 = vpop.f32.mrb[53].mxu0 }
 0x763 PF: > { %p2153_p5 = scmp.ge.s32.totalorder %s2297_s12, 2  ;;  %s1601_s19 = sand.u32 1, %s2285_s30  }
 0x764   : > { %s1602_s21 = scalar_lea.sflag [#allocation3], %s1601_s19 }
 0x765   : > { %p2150_p1 = pnand %p2153_p5, %p2398_p6 }
 0x767   : > { %2280 = dma.done.wait (!%p2150_p1), %s1602_s21, 896  }
 0x768   : > { %2282 = vsyncadd (!%p2150_p1), %s1602_s21, 4294966400  ;;  %s3062_s24 = sld [smem:[#allocation5_spill]]  ;;  %p20_p2 = scmp.ge.s32.totalorder %s2381_s15, 4  }
 0x769   : > { %s3063_s30 = smov %s2289_s10  ;;  %s3064_s10 = smov %s2293_s11 }
 0x76a   : > { %s3066_s12 = smov %s2381_s15  ;;  %22 = sbr.rel (!%p20_p2) target bundleno = 3 (0x3), region = 100 }
 0x76e   : > { %s3065_s11 = smov %s3062_s24 }
 0x771   :  { %1607 = vsyncpa [#allocation3], 1 }
 0x772   :  { %1609 = vsyncpa [#allocation3 + $0x1], 1 }

</bundles_post_ra>
